<compile_context>
chip_gen: v7x
topology: tpu7x:2x2x1
jax: 0.10.0
libtpu: 0.0.40
codegen_flags: <defaults>
</compile_context>

<pallas_src>
import functools
import numpy as np

import jax
import jax.numpy as jnp
from jax import lax
from jax.experimental import pallas as pl
from jax.experimental.pallas import tpu as pltpu

INPUT_FILTERS = 128
_TILE = 2048                            # uniform (k, n) weight-tile edge for the fused MLP
_M_PAD = 8                              # batch rows padded to one sublane group
_VMEM_LIMIT_BYTES = 48 * 1024 * 1024    # > v5e's 16 MiB scoped default, < v7x's 64 MiB physical


def _round_up(x, m):
    return (x + m - 1) // m * m


# ---------------------------------------------------------------------------
# AvgPool2d (count_include_pad=True) as one lane-dense matmul per (config, shape) group
# ---------------------------------------------------------------------------
def _pool_sel_matrix(in_size, kernel, stride, pad):
    out_size = (in_size + 2 * pad - kernel) // stride + 1
    o = np.arange(out_size)[:, None]
    i = np.arange(in_size)[None, :]
    start = o * stride - pad
    sel = (i >= start) & (i < start + kernel)
    return sel.astype(np.float32), out_size


def _pool_matmul_kernel(x_ref, p_ref, o_ref):
    o_ref[...] = jnp.dot(x_ref[...], p_ref[...],
                         preferred_element_type=jnp.float32).astype(o_ref.dtype)


def _avg_pool_grouped(fms, cfgs):
    """Pool each feature map; maps sharing (kernel, stride, pad, H, W) share one call."""
    groups, results = {}, [None] * len(fms)
    for idx, (fm, cfg) in enumerate(zip(fms, cfgs)):
        groups.setdefault((cfg, fm.shape[2], fm.shape[3]), []).append((idx, fm))
    for (cfg, H, W), items in groups.items():
        kern, st, pd = cfg
        sh, Ho = _pool_sel_matrix(H, kern, st, pd)
        sw, Wo = _pool_sel_matrix(W, kern, st, pd)
        # P[ih*W+iw, oh*Wo+ow] = Sh[oh, ih] * Sw[ow, iw] / k^2  ==  kron(Sh, Sw).T / k^2
        p = jnp.asarray(np.kron(sh, sw).T / float(kern * kern))
        xs = jnp.concatenate([fm.reshape(-1, H * W) for _, fm in items], axis=0)
        pooled = pl.pallas_call(
            _pool_matmul_kernel,
            out_shape=jax.ShapeDtypeStruct((xs.shape[0], Ho * Wo), xs.dtype),
            grid=(1,),
            in_specs=[pl.BlockSpec(xs.shape, lambda i: (0, 0)),
                      pl.BlockSpec(p.shape, lambda i: (0, 0))],
            out_specs=pl.BlockSpec((xs.shape[0], Ho * Wo), lambda i: (0, 0)),
        )(xs, p)
        off = 0
        for idx, fm in items:
            bc = fm.shape[0] * fm.shape[1]
            results[idx] = pooled[off:off + bc].reshape(fm.shape[0], fm.shape[1], Ho, Wo)
            off += bc
    return results


# ---------------------------------------------------------------------------
# 1x1 conv + ReLU as (Cout, Cin) @ (Cin, B*H*W): lane-dense streamed operand / output
# ---------------------------------------------------------------------------
def _conv1x1_relu_kernel(w_ref, x_ref, b_ref, o_ref):
    y = jnp.dot(w_ref[...], x_ref[...], preferred_element_type=jnp.float32) + b_ref[...]
    o_ref[...] = jnp.maximum(y, 0.0).astype(o_ref.dtype)


def conv1x1_relu_pallas(w, x_cm, b):
    """w: (Cout, Cin), x_cm: (Cin, M), b: (Cout,) -> relu(w @ x + b): (Cout, M)."""
    Cout, Cin = w.shape
    _, M = x_cm.shape
    return pl.pallas_call(
        _conv1x1_relu_kernel,
        out_shape=jax.ShapeDtypeStruct((Cout, M), jnp.float32),
        grid=(1,),
        in_specs=[pl.BlockSpec((Cout, Cin), lambda i: (0, 0)),
                  pl.BlockSpec((Cin, M), lambda i: (0, 0)),
                  pl.BlockSpec((Cout, 1), lambda i: (0, 0))],
        out_specs=pl.BlockSpec((Cout, M), lambda i: (0, 0)),
    )(w, x_cm, b.reshape(Cout, 1))


# ---------------------------------------------------------------------------
# Fused 4-layer MLP: int8 weight streaming, one pallas_call, head folded in
# ---------------------------------------------------------------------------
def _fused_mlp_kernel(a_in_ref, a_out_ref, nbg_ref, first_ref, last_ref, head_ref,
                      x_ref, w_ref, scale_ref, bias_ref, w4_ref, b4_ref,
                      o_ref, acc_ref, act_ref, *, n_k1_blocks, k4):
    i = pl.program_id(0)

    # Stage the (tiny) layer-1 activation into the resident ping-pong buffer once.
    @pl.when(i == 0)
    def _():
        act_ref[pl.ds(0, n_k1_blocks)] = x_ref[...]

    @pl.when(first_ref[i] == 1)
    def _():
        acc_ref[...] = jnp.zeros_like(acc_ref)

    # int8 weight tile -> bf16 (per-column scale applied in the epilogue), f32 accumulation.
    x = act_ref[a_in_ref[i]].astype(jnp.bfloat16)           # (M_pad, T)
    w = w_ref[0].astype(jnp.bfloat16)                        # (T, T)
    acc_ref[...] += jnp.dot(x, w, preferred_element_type=jnp.float32)

    # Layer epilogue: dequant scale + bias + ReLU, write into the other activation region.
    @pl.when(last_ref[i] == 1)
    def _():
        nbg = nbg_ref[i]
        y = acc_ref[...] * scale_ref[nbg] + bias_ref[nbg]
        act_ref[a_out_ref[i]] = jnp.maximum(y, 0.0)

    # Final Linear(1024 -> output_dims), padded to a lane-dense 128-wide output.
    @pl.when(head_ref[i] == 1)
    def _():
        h = act_ref[a_out_ref[i]][:, :k4]
        o_ref[...] = (jnp.dot(h, w4_ref[...], preferred_element_type=jnp.float32)
                      + b4_ref[...]).astype(o_ref.dtype)


def _pack_mlp(linears, tile=_TILE, m_pad=_M_PAD, lane=128):
    """Quantize + pre-tile the MLP for the fused streaming kernel.

    linears: 4 x ((K, N) f32 weight, (N,) f32 bias).  Layers 0..2 are streamed as
    int8 tiles (per-output-channel scales); layer 3 (the tiny head) stays f32 and
    is folded into the last epilogue.  Returns (pack dict, dequantized reference weights).
    """
    stream = linears[:-1]
    head_w, head_b = linears[-1]
    t = tile
    assert stream[-1][0].shape[1] <= t, "head input must fit one activation block"
    nks = [_round_up(w.shape[0], t) // t for w, _ in stream]
    nns = [_round_up(w.shape[1], t) // t for w, _ in stream]
    nk_region = max(nks + nns)

    tiles, scale_blks, bias_blks = [], [], []
    a_in, a_out, nbg, first, last, head = [], [], [], [], [], []
    ref_linears = []
    nb_base = 0
    for l, (w, b) in enumerate(stream):
        K, N = w.shape
        # symmetric per-output-channel int8 quantization
        s = jnp.maximum(jnp.max(jnp.abs(w), axis=0), 1e-12) / 127.0
        wq = jnp.clip(jnp.round(w / s[None, :]), -127.0, 127.0).astype(jnp.int8)
        ref_linears.append((wq.astype(jnp.float32) * s[None, :], b))

        kp, npd = _round_up(K, t), _round_up(N, t)
        nk, nn = kp // t, npd // t
        wqp = jnp.pad(wq, ((0, kp - K), (0, npd - N)))              # zero rows / cols
        tiles.append(wqp.reshape(nk, t, nn, t).transpose(2, 0, 1, 3).reshape(nn * nk, t, t))
        scale_blks.append(jnp.pad(s, (0, npd - N), constant_values=1.0).reshape(nn, 1, t))
        bias_blks.append(jnp.pad(b, (0, npd - N)).reshape(nn, 1, t))

        in_base = (l % 2) * nk_region
        out_base = ((l + 1) % 2) * nk_region
        is_last = l == len(stream) - 1
        for nb in range(nn):
            for kb in range(nk):
                a_in.append(in_base + kb)
                a_out.append(out_base + nb)
                nbg.append(nb_base + nb)
                first.append(int(kb == 0))
                last.append(int(kb == nk - 1))
                head.append(int(is_last and nb == nn - 1 and kb == nk - 1))
        nb_base += nn

    k4, out_dims = head_w.shape
    out_pad = _round_up(max(out_dims, 1), lane)
    w4 = jnp.pad(head_w, ((0, 0), (0, out_pad - out_dims)))
    b4 = jnp.pad(head_b, (0, out_pad - out_dims)).reshape(1, out_pad)
    ref_linears.append((head_w, head_b))

    as_i32 = lambda v: jnp.asarray(np.asarray(v, np.int32))
    pack = dict(
        w_tiles=jnp.concatenate(tiles, axis=0),
        scales=jnp.concatenate(scale_blks, axis=0),
        biases=jnp.concatenate(bias_blks, axis=0),
        w4=w4, b4=b4,
        a_in=as_i32(a_in), a_out=as_i32(a_out), nbg=as_i32(nbg),
        first=as_i32(first), last=as_i32(last), head=as_i32(head),
        tile=t, nk_region=nk_region, m_pad=m_pad, nk1=nks[0],
        k4=k4, out_dims=out_dims, out_pad=out_pad, n_tiles=len(a_in),
    )
    return pack, ref_linears


def fused_mlp_pallas(x_tiled, pack):
    t, m, nkr = pack["tile"], pack["m_pad"], pack["nk_region"]
    nk1, k4, out_pad = pack["nk1"], pack["k4"], pack["out_pad"]
    nb_total = pack["scales"].shape[0]
    kernel = functools.partial(_fused_mlp_kernel, n_k1_blocks=nk1, k4=k4)
    return pl.pallas_call(
        kernel,
        out_shape=jax.ShapeDtypeStruct((m, out_pad), jnp.float32),
        grid_spec=pltpu.PrefetchScalarGridSpec(
            num_scalar_prefetch=6,
            grid=(pack["n_tiles"],),
            in_specs=[
                pl.BlockSpec((nk1, m, t), lambda i, *_: (0, 0, 0)),        # layer-1 act (resident)
                pl.BlockSpec((1, t, t), lambda i, *_: (i, 0, 0)),          # streamed int8 tiles
                pl.BlockSpec((nb_total, 1, t), lambda i, *_: (0, 0, 0)),   # per-column scales
                pl.BlockSpec((nb_total, 1, t), lambda i, *_: (0, 0, 0)),   # biases
                pl.BlockSpec((k4, out_pad), lambda i, *_: (0, 0)),         # head weight (resident)
                pl.BlockSpec((1, out_pad), lambda i, *_: (0, 0)),          # head bias
            ],
            out_specs=pl.BlockSpec((m, out_pad), lambda i, *_: (0, 0)),
            scratch_shapes=[
                pltpu.VMEM((m, t), jnp.float32),            # f32 accumulator
                pltpu.VMEM((2 * nkr, m, t), jnp.float32),   # ping-pong activations
            ]),
        compiler_params=pltpu.CompilerParams(
            dimension_semantics=("arbitrary",),
            vmem_limit_bytes=_VMEM_LIMIT_BYTES),
    )(pack["a_in"], pack["a_out"], pack["nbg"], pack["first"], pack["last"], pack["head"],
      x_tiled, pack["w_tiles"], pack["scales"], pack["biases"], pack["w4"], pack["b4"])


# ---------------------------------------------------------------------------
# Discriminator parameters / forward
# ---------------------------------------------------------------------------
def init_params(key, input_dims, output_dims, size_in):
    dims = [INPUT_FILTERS * size_in * size_in, 4096, 2048, 1024, output_dims]
    keys = jax.random.split(key, 2 + 2 * 4)
    params = {}
    bound = 1.0 / np.sqrt(input_dims)            # 1x1 conv: fan_in = input_dims
    params["conv_w"] = jax.random.uniform(keys[0], (INPUT_FILTERS, input_dims),
                                          jnp.float32, -bound, bound)
    params["conv_b"] = jax.random.uniform(keys[1], (INPUT_FILTERS,),
                                          jnp.float32, -bound, bound)
    linears = []
    for i in range(4):
        bound = 1.0 / np.sqrt(dims[i])
        w = jax.random.uniform(keys[2 + 2 * i], (dims[i], dims[i + 1]),
                               jnp.float32, -bound, bound)
        b = jax.random.uniform(keys[3 + 2 * i], (dims[i + 1],),
                               jnp.float32, -bound, bound)
        linears.append((w, b))
    pack, ref_linears = _pack_mlp(linears)
    params["mlp"] = pack
    params["ref_linears"] = ref_linears          # dequantized copies, reference only
    return params


def _pool_configs(len_feature_map):
    strides = [2 ** (k + 1) for k in range(len_feature_map - 2)]
    padding = [2 ** k for k in range(len_feature_map - 2)]
    cfgs = [(strides[i] + 1, strides[i], padding[i]) for i in range(len(strides))]
    cfgs.append((strides[-1] + 1, strides[-1], padding[-1]))
    return cfgs


def discriminator_forward(params, feature_maps, len_feature_map, size_in):
    cfgs = _pool_configs(len_feature_map)
    pooled = _avg_pool_grouped(feature_maps[1:], cfgs)
    discri_input = jnp.concatenate([feature_maps[0]] + pooled, axis=1)

    B, C, H, W = discri_input.shape
    # layer_1: 1x1 conv + ReLU == (Cout, Cin) @ (Cin, B*H*W) per-pixel matmul.
    x_cm = jnp.transpose(discri_input, (1, 0, 2, 3)).reshape(C, B * H * W)
    conv_out = conv1x1_relu_pallas(params["conv_w"], x_cm, params["conv_b"])   # (128, B*H*W)
    # PyTorch-style channel-major flatten: (Cout, B, H*W) -> (B, Cout*H*W)
    act = jnp.transpose(conv_out.reshape(INPUT_FILTERS, B, H * W), (1, 0, 2))
    act = act.reshape(B, INPUT_FILTERS * H * W)                                # (B, K1) f32

    pack = params["mlp"]
    t, m, nk1 = pack["tile"], pack["m_pad"], pack["nk1"]
    assert B <= m
    k1_pad = nk1 * t
    x = jnp.zeros((m, k1_pad), jnp.float32).at[:B, :act.shape[1]].set(act)
    x_tiled = x.reshape(m, nk1, t).transpose(1, 0, 2)                          # (nk1, M_pad, T)
    out_full = fused_mlp_pallas(x_tiled, pack)
    return out_full[:B, :pack["out_dims"]]


# Pure-JAX reference (uses the same dequantized int8 weights; correctness check only)
def reference_forward(params, feature_maps, len_feature_map, size_in):
    cfgs = _pool_configs(len_feature_map)

    def avg_pool(x, kern, st, pd):
        s = lax.reduce_window(x, 0.0, lax.add, (1, 1, kern, kern), (1, 1, st, st),
                              [(0, 0), (0, 0), (pd, pd), (pd, pd)])
        return s / float(kern * kern)

    discri_input = feature_maps[0]
    for fm, (kern, st, pd) in zip(feature_maps[1:], cfgs):
        discri_input = jnp.concatenate([discri_input, avg_pool(fm, kern, st, pd)], axis=1)
    out = (jnp.einsum("bchw,oc->bohw", discri_input, params["conv_w"])
           + params["conv_b"][None, :, None, None])
    out = jnp.maximum(out, 0.0)
    out = out.reshape(out.shape[0], -1)
    for i, (w, b) in enumerate(params["ref_linears"]):
        out = out @ w + b
        if i < 3:
            out = jnp.maximum(out, 0.0)
    return out


if __name__ == "__main__":
    key = jax.random.PRNGKey(0)
    len_feature_map = 3
    size_in = 8
    output_dims = 2
    B = 2
    chans = [2, 1, 1]                 # channels per feature map
    input_dims = sum(chans)           # channels after concat -> conv input dims

    k_p, k0, k1, k2 = jax.random.split(key, 4)
    feature_maps = [
        jax.random.normal(k0, (B, chans[0], size_in, size_in), jnp.float32),
        jax.random.normal(k1, (B, chans[1], 2 * size_in, 2 * size_in), jnp.float32),
        jax.random.normal(k2, (B, chans[2], 2 * size_in, 2 * size_in), jnp.float32),
    ]
    params = init_params(k_p, input_dims, output_dims, size_in)

    out = discriminator_forward(params, feature_maps, len_feature_map, size_in)
    out = jax.block_until_ready(out)

    ref = reference_forward(params, feature_maps, len_feature_map, size_in)
    assert out.shape == (B, output_dims)
    np.testing.assert_allclose(np.asarray(out), np.asarray(ref), rtol=2e-2, atol=2e-2)
    print("KERNEL_OK")
</pallas_src>

<mosaic_0001>
module attributes {stable_mosaic.version = 11 : i64} {
  func.func @_pool_matmul_kernel(%arg0: i32, %arg1: memref<4x256xf32, #tpu.memory_space<vmem>>, %arg2: memref<256x64xf32, #tpu.memory_space<vmem>>, %arg3: memref<4x64xf32, #tpu.memory_space<vmem>>) attributes {dimension_semantics = [#tpu.dimension_semantics<arbitrary>], iteration_bounds = array<i64: 1>, scalar_prefetch = 0 : i64, scratch_operands = 0 : i64, tpu.core_type = #tpu.core_type<tc>, window_params = [{pipeline_mode = #tpu.pipeline_mode<synchronous>, transform_indices = @transform_0, window_bounds = array<i64: 4, 256>}, {pipeline_mode = #tpu.pipeline_mode<synchronous>, transform_indices = @transform_1, window_bounds = array<i64: 256, 64>}, {pipeline_mode = #tpu.pipeline_mode<synchronous>, transform_indices = @transform_2, window_bounds = array<i64: 4, 64>}]} {
    %c0 = arith.constant 0 : index
    %c0_0 = arith.constant 0 : index
    %0 = vector.load %arg1[%c0, %c0_0] : memref<4x256xf32, #tpu.memory_space<vmem>>, vector<4x256xf32>
    %c0_1 = arith.constant 0 : index
    %c0_2 = arith.constant 0 : index
    %1 = vector.load %arg2[%c0_1, %c0_2] : memref<256x64xf32, #tpu.memory_space<vmem>>, vector<256x64xf32>
    %cst = arith.constant dense<0.000000e+00> : vector<4x64xf32>
    %2 = tpu.matmul %0, %1, %cst {dimension_numbers = #tpu.dot_dimension_numbers<[1], [0], [0], [1], [0, 0, 1, 1], [], []>} : vector<4x256xf32>, vector<256x64xf32>, vector<4x64xf32> -> vector<4x64xf32>
    %c0_3 = arith.constant 0 : index
    %c0_4 = arith.constant 0 : index
    %3 = vector.load %arg3[%c0_3, %c0_4] : memref<4x64xf32, #tpu.memory_space<vmem>>, vector<4x64xf32>
    tpu.vector_store %arg3[%c0_3, %c0_4], %2 {strides = array<i32>} : memref<4x64xf32, #tpu.memory_space<vmem>>, vector<4x64xf32>,
    return
  }
  func.func @transform_0(%arg0: i32) -> (i32, i32) {
    %c0_i32 = arith.constant 0 : i32
    %c0_i32_0 = arith.constant 0 : i32
    %c0_i32_1 = arith.constant 0 : i32
    return %c0_i32, %c0_i32_0 : i32, i32
  }
  func.func @transform_1(%arg0: i32) -> (i32, i32) {
    %c0_i32 = arith.constant 0 : i32
    %c0_i32_0 = arith.constant 0 : i32
    %c0_i32_1 = arith.constant 0 : i32
    return %c0_i32, %c0_i32_0 : i32, i32
  }
  func.func @transform_2(%arg0: i32) -> (i32, i32) {
    %c0_i32 = arith.constant 0 : i32
    %c0_i32_0 = arith.constant 0 : i32
    %c0_i32_1 = arith.constant 0 : i32
    return %c0_i32, %c0_i32_0 : i32, i32
  }
}

</mosaic_0001>

<bundles_post_ra>
// kernel: tpu_custom_call.1
= control target key start
LH: loop header
LB: loop body
LE: loop exit
PB: predicated region body
PF: predicated region fallthrough
CT: control target
= control target key end

     0   :  { %s354_s0 = inlined_call_operand.vmem [shape: f32[4,256], index: 0, kind: input, shape index: {}]   ;;  %s355_s1 = inlined_call_operand.vmem [shape: f32[256,64], index: 1, kind: input, shape index: {}]   ;;  %s356_s2 = inlined_call_operand.hbm [shape: f32[4,64], index: 2, kind: output, shape index: {}]  }
   0x1   :  { %v29_v0 = vld [vmem:[%s355_s1 + $0x80] sm:$0xff]  ;;  %v30_v1 = vld [vmem:[%s355_s1 + $0x88] sm:$0xff]  ;;  %v31_v5 = vld [vmem:[%s355_s1 + $0x90] sm:$0xff] }
   0x2   :  { %v13_v2 = vld [vmem:[%s355_s1] sm:$0xff]  ;;  %v169_v3 = vpack.c.bf16 %v30_v1, %v29_v0  ;;  %v14_v4 = vld [vmem:[%s355_s1 + $0x8] sm:$0xff]  ;;  %v32_v6 = vld [vmem:[%s355_s1 + $0x98] sm:$0xff] }
   0x3   :  { %v171_v7 = vpack.c.bf16 %v14_v4, %v13_v2  ;;  %v173_v8 = vpack.c.bf16 %v32_v6, %v31_v5  ;;  %v15_v9 = vld [vmem:[%s355_s1 + $0x10] sm:$0xff]  ;;  %v16_v10 = vld [vmem:[%s355_s1 + $0x18] sm:$0xff]  ;;  %v33_v11 = vld [vmem:[%s355_s1 + $0xa0] sm:$0xff] }
   0x4   :  { %170 = vmatprep.subr.bf16.mxu0 %v169_v3  ;;  %v34_v12 = vld [vmem:[%s355_s1 + $0xa8] sm:$0xff]  ;;  %v175_v13 = vpack.c.bf16 %v16_v10, %v15_v9  ;;  %v17_v15 = vld [vmem:[%s355_s1 + $0x20] sm:$0xff]  ;;  %v35_v17 = vld [vmem:[%s355_s1 + $0xb0] sm:$0xff] }
   0x5   :  { %172 = vmatpush3.bf16.msra.mxu0 %v171_v7  ;;  %v177_v14 = vpack.c.bf16 %v34_v12, %v33_v11  ;;  %v18_v16 = vld [vmem:[%s355_s1 + $0x28] sm:$0xff]  ;;  %v36_v18 = vld [vmem:[%s355_s1 + $0xb8] sm:$0xff]  ;;  %v19_v21 = vld [vmem:[%s355_s1 + $0x30] sm:$0xff] }
   0x6   :  { %174 = vmatprep.subr.bf16.mxu0 %v173_v8  ;;  %v179_v19 = vpack.c.bf16 %v18_v16, %v17_v15  ;;  %v181_v20 = vpack.c.bf16 %v36_v18, %v35_v17  ;;  %v20_v22 = vld [vmem:[%s355_s1 + $0x38] sm:$0xff]  ;;  %v37_v23 = vld [vmem:[%s355_s1 + $0xc0] sm:$0xff]  ;;  %v38_v24 = vld [vmem:[%s355_s1 + $0xc8] sm:$0xff] }
   0x7   :  { %v12_v25 = vld [vmem:[%s354_s0] sm:$0xff] }
   0x8   :  { %v46_v26 = vcombine.high %v12_v25, %v12_v25 }
   0x9   :  { %176 = vmatpush3.bf16.msra.mxu0 %v175_v13 }
   0xa   :  { %178 = vmatprep.subr.bf16.mxu0 %v177_v14 }
   0xb   :  { %7 = vsyncpa [#allocation3], 0  ;;  %v183_v27 = vpack.c.bf16 %v20_v22, %v19_v21  ;;  %v185_v28 = vpack.c.bf16 %v38_v24, %v37_v23  ;;  %v21_v29 = vld [vmem:[%s355_s1 + $0x40] sm:$0xff]  ;;  %v22_v30 = vld [vmem:[%s355_s1 + $0x48] sm:$0xff]  ;;  %112 = vmatprep.mubr.f32.mxu0 %v46_v26  ;;  %s227_s18 = smov [#allocation2]   ;;  %vm118_vm0 = vcmask 519168  }
   0xc   :  { %v39_v31 = vld [vmem:[%s355_s1 + $0xd0] sm:$0xff]  ;;  %v40_v32 = vld [vmem:[%s355_s1 + $0xd8] sm:$0xff]  ;;  %v187_v33 = vpack.c.bf16 %v22_v30, %v21_v29  ;;  %v41_v37 = vld [vmem:[%s355_s1 + $0xe0] sm:$0xff]  ;;  %s126_s19 = sshll.u32 %s227_s18, 4  ;;  %s127_s19 = int_to_ptr.vmem [resolvable:$true] %s126_s19 }
   0xd   :  { %180 = vmatpush3.bf16.msra.mxu0 %v179_v19  ;;  %v189_v34 = vpack.c.bf16 %v40_v32, %v39_v31  ;;  %v23_v35 = vld [vmem:[%s355_s1 + $0x50] sm:$0xff]  ;;  %v24_v36 = vld [vmem:[%s355_s1 + $0x58] sm:$0xff]  ;;  %v42_v38 = vld [vmem:[%s355_s1 + $0xe8] sm:$0xff]  ;;  %s203_s20 = scalar_lea.vmem %s127_s19, 64  ;;  %p208_p1 = scmp.lt.s32.totalorder %s127_s19, %s127_s19 }
   0xe   :  { %182 = vmatprep.subr.bf16.mxu0 %v181_v20  ;;  %v191_v39 = vpack.c.bf16 %v24_v36, %v23_v35  ;;  %v193_v40 = vpack.c.bf16 %v42_v38, %v41_v37  ;;  %v25_v41 = vld [vmem:[%s355_s1 + $0x60] sm:$0xff]  ;;  %v26_v42 = vld [vmem:[%s355_s1 + $0x68] sm:$0xff]  ;;  %v43_v43 = vld [vmem:[%s355_s1 + $0xf0] sm:$0xff]  ;;  %p204_p0 = scmp.ne.s32.totalorder %s127_s19, %s203_s20  ;;  %p209_p2 = scmp.lt.s32.totalorder %s203_s20, %s203_s20 }
   0xf   :  { %v44_v44 = vld [vmem:[%s355_s1 + $0xf8] sm:$0xff]  ;;  %v195_v45 = vpack.c.bf16 %v26_v42, %v25_v41  ;;  %v27_v47 = vld [vmem:[%s355_s1 + $0x70] sm:$0xff] }
  0x10   :  { %v197_v46 = vpack.c.bf16 %v44_v44, %v43_v43  ;;  %v28_v48 = vld [vmem:[%s355_s1 + $0x78] sm:$0xff]  ;;  %p210_p3 = por %p209_p2, %p208_p1 }
  0x11   :  { %184 = vmatpush3.bf16.msra.mxu0 %v183_v27  ;;  %v199_v49 = vpack.c.bf16 %v28_v48, %v27_v47 }
  0x12   :  { %186 = vmatprep.subr.bf16.mxu0 %v185_v28  ;;  %p211_p4 = pnand %p210_p3, %p204_p0 }
  0x15   :  { %188 = vmatpush3.bf16.msra.mxu0 %v187_v33 }
  0x16   :  { %190 = vmatprep.subr.bf16.mxu0 %v189_v34 }
  0x19   :  { %192 = vmatpush3.bf16.msra.mxu0 %v191_v39 }
  0x1a   :  { %194 = vmatprep.subr.bf16.mxu0 %v193_v40 }
  0x1d   :  { %196 = vmatpush3.bf16.msra.mxu0 %v195_v45 }
  0x1e   :  { %198 = vmatprep.subr.bf16.mxu0 %v197_v46 }
  0x21   :  { %200 = vmatpush3.bf16.msra.mxu0 %v199_v49 }
  0x24   :  { %113 = vmatmul.mubr.f32.vlgmr.msra.gmra.mrb[0].mxu0 %v12_v25 }
  0xf7   :  { %v166_v50 = vpop.f32.mrb[0].mxu0 }
  0xf8   :  { %v167_v51 = vpop.f32.mrb[1].mxu0 }
  0xf9   :  { %v168_v52 = vadd.f32 %v167_v51, %v166_v50 }
  0xfb   :  { %119 = vst.msk [vmem:[#allocation2] sm:$0xf] %vm118_vm0, %v168_v52 }
  0xfc   :  { %214 = shalt.err (!%p211_p4)
}
  0xfd   :  { %s215_s22 = scalar_lea.hbm %s356_s2, 64 }
  0xfe   :  { %p216_p5 = scmp.ne.s32.totalorder %s356_s2, %s215_s22  ;;  %p219_p6 = scmp.lt.u32.totalorder %s215_s22, %s356_s2 }
 0x100   :  { %p221_p7 = pnand %p219_p6, %p216_p5 }
 0x102   :  { %224 = shalt.err (!%p221_p7)
}
 0x103   :  { %129 = dma.vmem_to_hbm [thread:$0]  %s127_s19, 64, %s356_s2, [#allocation3]  }
 0x104   :  { %225 = dma.done.wait [#allocation3], 64  }
 0x105   :  { %226 = vsyncadd [#allocation3], 4294967232 }
 0x106   :  { %133 = vsyncpa [#allocation3], 1 }

</bundles_post_ra>
